<compile_context>
chip_gen: v7x
topology: tpu7x:2x2x1
jax: 0.10.0
libtpu: 0.0.40
codegen_flags: <defaults>
</compile_context>

<pallas_src>
import functools

import jax
import jax.numpy as jnp
from jax.experimental import pallas as pl
from jax.experimental.pallas import tpu as pltpu

LEAKY_SLOPE = 0.2
BN_EPS = 1e-5


def _round_up(x, m):
    return (x + m - 1) // m * m


def _stats_kernel(p_ref, w_ref, stats_ref):
    """Pass 1: conv tile on the MXU, then per-channel sum / sum-of-squares
    accumulated across M tiles into a grid-resident (2, Cout_pad) block."""
    @pl.when(pl.program_id(0) == 0)
    def _():
        stats_ref[...] = jnp.zeros_like(stats_ref)

    y = jnp.dot(p_ref[...], w_ref[...], preferred_element_type=jnp.float32)
    s = jnp.sum(y, axis=0, keepdims=True)          # (1, Cout_pad)
    ss = jnp.sum(y * y, axis=0, keepdims=True)     # (1, Cout_pad)
    stats_ref[...] += jnp.concatenate([s, ss], axis=0)


def _norm_kernel(p_ref, w_ref, stats_ref, gamma_ref, beta_ref, o_ref, *, m_total):
    """Pass 2: recompute the conv tile, apply BatchNorm (training-mode batch
    statistics, biased variance) and LeakyReLU(0.2). All stats math in f32."""
    y = jnp.dot(p_ref[...], w_ref[...], preferred_element_type=jnp.float32)

    inv_m = 1.0 / float(m_total)                   # true M (padded rows are zero)
    mean = stats_ref[0:1, :] * inv_m
    var = jnp.maximum(stats_ref[1:2, :] * inv_m - mean * mean, 0.0)
    inv_std = jax.lax.rsqrt(var + BN_EPS)
    scale = gamma_ref[...] * inv_std               # (1, Cout_pad), broadcasts
    shift = beta_ref[...] - mean * scale

    z = y * scale + shift
    o_ref[...] = jnp.where(z >= 0, z, LEAKY_SLOPE * z).astype(o_ref.dtype)


def down_forward(x_nchw, w_oihw, gamma, beta, *, tile_m=512):
    N, Cin, H, W = x_nchw.shape
    Cout, _, KH, KW = w_oihw.shape
    SH = SW = 2
    PH = PW = 1
    OH = (H + 2 * PH - KH) // SH + 1
    OW = (W + 2 * PW - KW) // SW + 1
    M = N * OH * OW
    K = KH * KW * Cin

    # Lane-dense padding: K and Cout rounded up to 128 (unmasked stores, full
    # MXU passes).  Padded channels are sliced off at the end.
    K_pad = _round_up(K, 128)
    C_pad = _round_up(Cout, 128)

    # --- im2col glue (NCHW -> NHWC, zero-pad, patch extraction), bf16 ---
    x = jnp.transpose(x_nchw, (0, 2, 3, 1))
    x = jnp.pad(x, ((0, 0), (PH, PH), (PW, PW), (0, 0)))
    cols = []
    for kh in range(KH):
        for kw in range(KW):
            cols.append(x[:, kh:kh + SH * OH:SH, kw:kw + SW * OW:SW, :])
    patches = jnp.stack(cols, axis=3).reshape(M, K)   # (M, K)

    # M tiling; zero-row padding is harmless for BN sums (divide by true M).
    tile_m_eff = min(_round_up(tile_m, 8), _round_up(M, 8))
    M_pad = _round_up(M, tile_m_eff)
    num_tiles = M_pad // tile_m_eff

    patches = jnp.pad(patches, ((0, M_pad - M), (0, K_pad - K))).astype(jnp.bfloat16)
    w = jnp.transpose(w_oihw, (2, 3, 1, 0)).reshape(K, Cout)
    w = jnp.pad(w, ((0, K_pad - K), (0, C_pad - Cout))).astype(jnp.bfloat16)
    gamma_p = jnp.pad(gamma.astype(jnp.float32), (0, C_pad - Cout),
                      constant_values=1.0).reshape(1, C_pad)
    beta_p = jnp.pad(beta.astype(jnp.float32), (0, C_pad - Cout)).reshape(1, C_pad)

    p_spec = pl.BlockSpec((tile_m_eff, K_pad), lambda i: (i, 0))
    w_spec = pl.BlockSpec((K_pad, C_pad), lambda i: (0, 0))
    vec_spec = pl.BlockSpec((1, C_pad), lambda i: (0, 0))
    stats_spec = pl.BlockSpec((2, C_pad), lambda i: (0, 0))

    # ---- Pass 1: global BN statistics (sum, sum of squares) per channel ----
    stats = pl.pallas_call(
        _stats_kernel,
        out_shape=jax.ShapeDtypeStruct((2, C_pad), jnp.float32),
        grid=(num_tiles,),
        in_specs=[p_spec, w_spec],
        out_specs=stats_spec,   # same block every step -> resident accumulator
        compiler_params=pltpu.CompilerParams(
            dimension_semantics=("arbitrary",)),
    )(patches, w)

    # ---- Pass 2: conv + normalize + affine + LeakyReLU, tiled over M ----
    out_flat = pl.pallas_call(
        functools.partial(_norm_kernel, m_total=M),
        out_shape=jax.ShapeDtypeStruct((M_pad, C_pad), jnp.float32),
        grid=(num_tiles,),
        in_specs=[p_spec, w_spec, stats_spec, vec_spec, vec_spec],
        out_specs=pl.BlockSpec((tile_m_eff, C_pad), lambda i: (i, 0)),
        compiler_params=pltpu.CompilerParams(
            dimension_semantics=("parallel",)),
    )(patches, w, stats, gamma_p, beta_p)

    out = out_flat[:M, :Cout].reshape(N, OH, OW, Cout)
    return jnp.transpose(out, (0, 3, 1, 2))  # back to NCHW


def _reference(x, w, gamma, beta):
    """Pure-JAX f32 reference of the Down forward (training-mode BN)."""
    y = jax.lax.conv_general_dilated(
        x, w, window_strides=(2, 2), padding=((1, 1), (1, 1)),
        dimension_numbers=("NCHW", "OIHW", "NCHW"))
    mean = y.mean(axis=(0, 2, 3), keepdims=True)
    var = ((y - mean) ** 2).mean(axis=(0, 2, 3), keepdims=True)
    z = (y - mean) * jax.lax.rsqrt(var + BN_EPS)
    z = z * gamma.reshape(1, -1, 1, 1) + beta.reshape(1, -1, 1, 1)
    return jnp.where(z >= 0, z, LEAKY_SLOPE * z)


if __name__ == "__main__":
    key = jax.random.PRNGKey(0)
    k_x, k_w = jax.random.split(key)
    N, Cin, H, W = 2, 4, 16, 16
    Cout = 8

    x = jax.random.normal(k_x, (N, Cin, H, W), dtype=jnp.float32)
    # Deterministic synthetic conv weight (PyTorch layout OIHW), no bias.
    w = jax.random.normal(k_w, (Cout, Cin, 4, 4), dtype=jnp.float32) * 0.1
    # BatchNorm2d default affine init: weight=1, bias=0.
    gamma = jnp.ones((Cout,), jnp.float32)
    beta = jnp.zeros((Cout,), jnp.float32)

    # tile_m=64 so the demo exercises a multi-tile grid (M = 128 -> 2 tiles).
    out = down_forward(x, w, gamma, beta, tile_m=64)
    jax.block_until_ready(out)

    assert out.shape == (N, Cout, H // 2, W // 2)
    ref = _reference(x, w, gamma, beta)
    max_err = float(jnp.max(jnp.abs(out - ref)))
    assert jnp.all(jnp.isfinite(out)) and max_err < 6e-2, f"max_err={max_err}"
    print("KERNEL_OK")
</pallas_src>

<mosaic_0001>
module attributes {stable_mosaic.version = 11 : i64} {
  func.func @_stats_kernel(%arg0: i32, %arg1: memref<64x128xbf16, #tpu.memory_space<vmem>>, %arg2: memref<128x128xbf16, #tpu.memory_space<vmem>>, %arg3: memref<2x128xf32, #tpu.memory_space<vmem>>) attributes {dimension_semantics = [#tpu.dimension_semantics<arbitrary>], iteration_bounds = array<i64: 2>, scalar_prefetch = 0 : i64, scratch_operands = 0 : i64, tpu.core_type = #tpu.core_type<tc>, window_params = [{transform_indices = @transform_0, window_bounds = array<i64: 64, 128>}, {pipeline_mode = #tpu.pipeline_mode<synchronous>, transform_indices = @transform_1, window_bounds = array<i64: 128, 128>}, {pipeline_mode = #tpu.pipeline_mode<synchronous>, transform_indices = @transform_2, window_bounds = array<i64: 2, 128>}]} {
    %c0_i32 = arith.constant 0 : i32
    %0 = arith.cmpi eq, %arg0, %c0_i32 : i32
    %1 = arith.extui %0 : i1 to i32
    %c0_i32_0 = arith.constant 0 : i32
    %2 = arith.cmpi ne, %1, %c0_i32_0 : i32
    scf.if %2 {
      %cst_10 = arith.constant 0.000000e+00 : f32
      %15 = vector.broadcast %cst_10 : f32 to vector<2x128xf32>
      %c0_11 = arith.constant 0 : index
      %c0_12 = arith.constant 0 : index
      %16 = vector.load %arg3[%c0_11, %c0_12] : memref<2x128xf32, #tpu.memory_space<vmem>>, vector<2x128xf32>
      tpu.vector_store %arg3[%c0_11, %c0_12], %15 {strides = array<i32>} : memref<2x128xf32, #tpu.memory_space<vmem>>, vector<2x128xf32>,
    } else {
    }
    %c0 = arith.constant 0 : index
    %c0_1 = arith.constant 0 : index
    %3 = vector.load %arg1[%c0, %c0_1] : memref<64x128xbf16, #tpu.memory_space<vmem>>, vector<64x128xbf16>
    %c0_2 = arith.constant 0 : index
    %c0_3 = arith.constant 0 : index
    %4 = vector.load %arg2[%c0_2, %c0_3] : memref<128x128xbf16, #tpu.memory_space<vmem>>, vector<128x128xbf16>
    %cst = arith.constant dense<0.000000e+00> : vector<64x128xf32>
    %5 = tpu.matmul %3, %4, %cst {dimension_numbers = #tpu.dot_dimension_numbers<[1], [0], [0], [1], [0, 0, 1, 1], [], []>} : vector<64x128xbf16>, vector<128x128xbf16>, vector<64x128xf32> -> vector<64x128xf32>
    %cst_4 = arith.constant dense<0.000000e+00> : vector<128xf32>
    %6 = vector.multi_reduction <add>, %5, %cst_4 [0] : vector<64x128xf32> to vector<128xf32>
    %7 = vector.shape_cast %6 : vector<128xf32> to vector<1x128xf32>
    %8 = arith.mulf %5, %5 : vector<64x128xf32>
    %cst_5 = arith.constant dense<0.000000e+00> : vector<128xf32>
    %9 = vector.multi_reduction <add>, %8, %cst_5 [0] : vector<64x128xf32> to vector<128xf32>
    %10 = vector.shape_cast %9 : vector<128xf32> to vector<1x128xf32>
    %c0_6 = arith.constant 0 : index
    %c0_7 = arith.constant 0 : index
    %11 = vector.load %arg3[%c0_6, %c0_7] : memref<2x128xf32, #tpu.memory_space<vmem>>, vector<2x128xf32>
    %12 = tpu.concatenate %7, %10 in 0 : vector<1x128xf32>, vector<1x128xf32> -> vector<2x128xf32>
    %13 = arith.addf %11, %12 : vector<2x128xf32>
    %c0_8 = arith.constant 0 : index
    %c0_9 = arith.constant 0 : index
    %14 = vector.load %arg3[%c0_8, %c0_9] : memref<2x128xf32, #tpu.memory_space<vmem>>, vector<2x128xf32>
    tpu.vector_store %arg3[%c0_8, %c0_9], %13 {strides = array<i32>} : memref<2x128xf32, #tpu.memory_space<vmem>>, vector<2x128xf32>,
    return
  }
  func.func @transform_0(%arg0: i32) -> (i32, i32) {
    %c0_i32 = arith.constant 0 : i32
    %c0_i32_0 = arith.constant 0 : i32
    return %arg0, %c0_i32 : i32, i32
  }
  func.func @transform_1(%arg0: i32) -> (i32, i32) {
    %c0_i32 = arith.constant 0 : i32
    %c0_i32_0 = arith.constant 0 : i32
    %c0_i32_1 = arith.constant 0 : i32
    return %c0_i32, %c0_i32_0 : i32, i32
  }
  func.func @transform_2(%arg0: i32) -> (i32, i32) {
    %c0_i32 = arith.constant 0 : i32
    %c0_i32_0 = arith.constant 0 : i32
    %c0_i32_1 = arith.constant 0 : i32
    return %c0_i32, %c0_i32_0 : i32, i32
  }
}

</mosaic_0001>

<bundles_post_ra>
// kernel: tpu_custom_call.1
= control target key start
LH: loop header
LB: loop body
LE: loop exit
PB: predicated region body
PF: predicated region fallthrough
CT: control target
= control target key end

     0   :  { %7 = vsyncpa [#allocation3], 0  ;;  %s915_s0 = inlined_call_operand.hbm [shape: bf16[128,128], index: 0, kind: input, shape index: {}]   ;;  %s916_s1 = inlined_call_operand.hbm [shape: bf16[128,128], index: 1, kind: input, shape index: {}]   ;;  %s917_s2 = inlined_call_operand.hbm [shape: f32[2,128], index: 2, kind: output, shape index: {}]  }
   0x1   :  { %9 = vsyncpa [#allocation3 + $0x1], 0 }
   0x2   :  { %10 = vsyncpa [#allocation6], 0 }
   0x3   :  { %11 = vsyncpa [#allocation4], 0  ;;  %s740_s9 = smov 0   ;;  %s742_s10 = smov 0  }
   0x4   :  { %s744_s11 = smov 0   ;;  %s746_s12 = smov 0  }
   0x5 LB: > { %s759_s13 = sadd.s32 4294967295, %s717_s12   ;;  %p37_p0 = scmp.ne.s32.totalorder %s709_s10, %s705_s9  ;;  %s717_s12 = sphi %s746_s12, %s933_s12   ;;  %s713_s11 = sphi %s744_s11, %s932_s11   ;;  %s709_s10 = sphi %s742_s10, %s931_s10   ;;  %s705_s9 = sphi %s740_s9, %s930_s9  }
   0x6   : > { %p918_p1 = scmp.eq.s32.totalorder %s759_s13, 0  ;;  %p440_p2 = scmp.ge.s32.totalorder %s717_s12, 1 }
   0x7   : > { %p90_p3 = scmp.lt.s32.totalorder %s717_s12, 3  ;;  %s719_s16 = smov [#allocation5]  }
   0x8   : > { %p768_p5 = por %p918_p1, %p37_p0  ;;  %s102_s17 = sshll.u32 %s719_s16, 4  ;;  %s103_s17 = int_to_ptr.vmem [resolvable:$true] %s102_s17 }
   0x9   : > { %p772_p6 = pnand %p440_p2, %p90_p3  ;;  %s785_s19 = sadd.s32 1, %s717_s12  }
   0xa   : > { %s921_s14 = scalar_select %p768_p5, 1, 0 }
   0xb   : > { %s922_s15 = scalar_select %p772_p6, 1, 0 }
   0xc   : > { %p529_p7 = pneg %p772_p6  ;;  %s24_s20 = sadd.s32 1, %s713_s11 }
   0xd   : > { %s21_s21 = ssub.s32 %s717_s12, %s785_s19  ;;  %s591_s24 = scalar_lea.hbm %s916_s1, 1024 }
   0xe   : > { %p780_p8 = pnand %p529_p7, %p918_p1  ;;  %p592_p9 = scmp.ne.s32.totalorder %s916_s1, %s591_s24 }
   0xf   : > { %p598_p13 = scmp.lt.u32.totalorder %s591_s24, %s916_s1 }
  0x10   : > { %p593_p10 = pneg %p780_p8 }
  0x12   : > { %p594_p11 = pnand %p593_p10, %p592_p9 }
  0x14   : > { %p595_p12 = pneg %p594_p11 }
  0x16   : > { %p600_p0 = pnand %p598_p13, %p595_p12 }
  0x18   : > { %603 = shalt.err (!%p600_p0)
}
  0x19   : > { %s604_s29 = scalar_lea.vmem %s103_s17, 1024  ;;  %p612_p4 = scmp.lt.s32.totalorder %s103_s17, %s103_s17 }
  0x1a   : > { %p605_p2 = scmp.ne.s32.totalorder %s103_s17, %s604_s29  ;;  %p613_p1 = scmp.lt.s32.totalorder %s604_s29, %s604_s29 }
  0x1c   : > { %p607_p3 = pnand %p605_p2, %p593_p10  ;;  %p614_p5 = por %p613_p1, %p612_p4 }
  0x1e   : > { %p608_p7 = pneg %p607_p3 }
  0x20   : > { %p615_p6 = pnand %p614_p5, %p608_p7 }
  0x22   : > { %618 = shalt.err (!%p615_p6)
}
  0x23   : > { %s720_s30 = smov 64   ;;  %s721_s3 = smov 4  }
  0x24   : > { %532 = dma.hbm_to_vmem [thread:$0]  (!%p780_p8), %s916_s1, 1024, %s103_s17, [#allocation6], %s720_s30, %s720_s30, %s721_s3  }
  0x25   : > { %p22_p1 = scmp.eq.s32.totalorder %s21_s21, 0  ;;  %p31_p4 = scmp.ne.s32.totalorder %s713_s11, %s709_s10 }
  0x26   : > { %p32_p5 = scmp.eq.s32.totalorder %s717_s12, 0  ;;  %p538_p6 = scmp.lt.s32.totalorder %s717_s12, 2 }
  0x27   : > { %s814_s6 = scalar_select %p22_p1, %s713_s11, %s24_s20  }
  0x28   : > { %p33_p9 = por %p32_p5, %p31_p4  ;;  %s116_s7 = sand.u32 1, %s713_s11  }
  0x29   : > { %s443_s8 = sshll.u32 %s116_s7, 5  ;;  %s466_s9 = sshll.u32 %s717_s12, 9 }
  0x2a   : > { %s821_s18 = scalar_lea.hbm %s915_s0, %s466_s9  ;;  %s120_s17 = scalar_lea.vmem [#allocation2], %s443_s8 }
  0x2b   : > { %s127_s21 = sshll.u32 %s120_s17, 4  ;;  %p825_p8 = pnand %p538_p6, %p33_p9  ;;  %s823_s21 = int_to_ptr.vmem [resolvable:$true] %s127_s21 }
  0x2c   : > { %s829_s12 = scalar_lea.sflag [#allocation3], %s116_s7  ;;  %s619_s23 = scalar_lea.hbm %s821_s18, 512 }
  0x2d   : > { %p620_p10 = scmp.ne.s32.totalorder %s821_s18, %s619_s23  ;;  %p621_p11 = pneg %p825_p8 }
  0x2e   : > { %s624_s26 = scalar_lea.hbm %s915_s0, 1024  ;;  %p625_p0 = scmp.lt.u32.totalorder %s821_s18, %s915_s0 }
  0x2f   : > { %p622_p12 = pnand %p621_p11, %p620_p10  ;;  %p626_p2 = scmp.lt.u32.totalorder %s624_s26, %s619_s23 }
  0x30   : > { %p628_p7 = scmp.lt.u32.totalorder %s619_s23, %s821_s18 }
  0x31   : > { %p623_p13 = pneg %p622_p12  ;;  %p627_p3 = por %p626_p2, %p625_p0 }
  0x33   : > { %p629_p1 = por %p628_p7, %p627_p3 }
  0x35   : > { %p630_p4 = pnand %p629_p1, %p623_p13 }
  0x37   : > { %633 = shalt.err (!%p630_p4)
}
  0x38   : > { %s634_s29 = scalar_lea.vmem %s823_s21, 512  ;;  %s722_s4 = smov [#allocation2]  }
  0x39   : > { %p635_p5 = scmp.ne.s32.totalorder %s823_s21, %s634_s29  ;;  %s639_s5 = sshll.u32 %s722_s4, 4  ;;  %s640_s5 = int_to_ptr.vmem [resolvable:$false] %s639_s5 }
  0x3a   : > { %s641_s7 = scalar_lea.vmem %s640_s5, 1024  ;;  %p642_p10 = scmp.lt.s32.totalorder %s823_s21, %s640_s5 }
  0x3b   : > { %p637_p6 = pnand %p635_p5, %p621_p11  ;;  %p643_p12 = scmp.lt.s32.totalorder %s641_s7, %s634_s29 }
  0x3d   : > { %p638_p9 = pneg %p637_p6  ;;  %p644_p0 = por %p643_p12, %p642_p10 }
  0x3f   : > { %p645_p2 = pnand %p644_p0, %p638_p9 }
  0x41   : > { %648 = shalt.err (!%p645_p2)
}
  0x42   : > { %536 = dma.hbm_to_vmem [thread:$0]  (!%p825_p8), %s821_s18, 512, %s823_s21, %s829_s12, %s720_s30, %s720_s30, %s721_s3  }
  0x43   : > { %p925_p11 = scmp.ne.s32.totalorder %s922_s15, 0 }
  0x44   : > { %s141_s8 = sand.u32 (!%p925_p11), 1, %s709_s10   ;;  %p926_p13 = scmp.ne.s32.totalorder (!%p925_p11), %s921_s14, 0 }
  0x45   : > { %139 = sbr.rel (%p925_p11) target bundleno = 383 (0x17f), region = 28  ;;  %s447_s9 = sshll.u32 (!%p925_p11), %s141_s8, 5 }
  0x46   : > { %s142_s16 = scalar_lea.sflag (!%p925_p11), [#allocation3], %s141_s8  ;;  %s863_s22 = scalar_lea.vmem (!%p925_p11), [#allocation2], %s447_s9 }
  0x4c   : > { %692 = dma.done.wait (%p926_p13), %s142_s16, 512  }
  0x4d   : > { %694 = vsyncadd (%p926_p13), %s142_s16, 4294966784  ;;  %p927_p3 = scmp.eq.s32.totalorder %s759_s13, 0 }
  0x4f   : > { %696 = dma.done.wait (%p927_p3), [#allocation6], 1024   ;;  %p928_p8 = pmov %p927_p3 }
  0x50   : > { %p929_p7 = scmp.ne.s32.totalorder %s759_s13, 0 }
  0x51   : > { %698 = vsyncadd (%p928_p8), [#allocation6], 4294966272  ;;  %v723_v0 = vmov (!%p929_p7), 0.0  }
  0x52   : > { %170 = sbr.rel (%p929_p7) target bundleno = 89 (0x59), region = 40  ;;  %171 = vst [vmem:[#allocation7] sm:$0x3] (!%p929_p7), %v723_v0 }
  0x59 PF: > { %v579_v1 = vld [vmem:[#allocation5] sm:$0xff]   ;;  %v580_v2 = vld [vmem:[#allocation5 + $0x8] sm:$0xff]   ;;  %v581_v3 = vld [vmem:[#allocation5 + $0x10] sm:$0xff]   ;;  %vm368_vm0 = vcmask 1040384   ;;  %s724_s14 = smov [#allocation7]   ;;  %p540_p1 = scmp.eq.s32.totalorder %s759_s13, 1 }
  0x5a   : > { %479 = vmatprep.subr.bf16.mxu0 %v579_v1  ;;  %503 = vmatprep.subr.bf16.mxu1 %v579_v1  ;;  %v582_v4 = vld [vmem:[#allocation5 + $0x18] sm:$0xff]   ;;  %v587_v5 = vld [vmem:[%s863_s22] sm:$0xff]   ;;  %v589_v6 = vld [vmem:[%s863_s22 + $0x10] sm:$0xff]   ;;  %s379_s15 = sshll.u32 %s724_s14, 4  ;;  %s380_s15 = int_to_ptr.vmem [resolvable:$true] %s379_s15 }
  0x5b   : > { %480 = vmatpush3.bf16.msra.mxu0 %v579_v1  ;;  %511 = vmatpush3.bf16.msra.mxu1 %v579_v1  ;;  %v583_v7 = vld [vmem:[#allocation5 + $0x20] sm:$0xff]   ;;  %v584_v8 = vld [vmem:[#allocation5 + $0x28] sm:$0xff]   ;;  %v585_v9 = vld [vmem:[#allocation5 + $0x30] sm:$0xff]   ;;  %s649_s30 = scalar_lea.vmem %s380_s15, 32  ;;  %p656_p9 = scmp.lt.s32.totalorder %s380_s15, %s380_s15 }
  0x5c   : > { %481 = vmatprep.subr.bf16.mxu0 %v580_v2  ;;  %504 = vmatprep.subr.bf16.mxu1 %v580_v2  ;;  %v586_v10 = vld [vmem:[#allocation5 + $0x38] sm:$0xff]   ;;  %v588_v11 = vld [vmem:[%s863_s22 + $0x8] sm:$0xff]   ;;  %v367_v55 = vld [vmem:[#allocation7] sm:$0x3]  ;;  %p650_p4 = scmp.ne.s32.totalorder %s380_s15, %s649_s30  ;;  %p657_p10 = scmp.lt.s32.totalorder %s649_s30, %s649_s30 }
  0x5d   : > { %495 = vmatprep.mubr.bf16.mxu0 %v587_v5  ;;  %499 = vmatprep.mubr.bf16.mxu1 %v589_v6  ;;  %v590_v12 = vld [vmem:[%s863_s22 + $0x18] sm:$0xff]  }
  0x5e   : > { %p651_p5 = pnand %p650_p4, %p540_p1  ;;  %p658_p12 = por %p657_p10, %p656_p9 }
  0x5f   : > { %482 = vmatpush3.bf16.msra.mxu0 %v580_v2  ;;  %512 = vmatpush3.bf16.msra.mxu1 %v580_v2 }
  0x60   : > { %483 = vmatprep.subr.bf16.mxu0 %v581_v3  ;;  %505 = vmatprep.subr.bf16.mxu1 %v581_v3  ;;  %p652_p6 = pneg %p651_p5 }
  0x62   : > { %p659_p0 = pnand %p658_p12, %p652_p6 }
  0x63   : > { %484 = vmatpush3.bf16.msra.mxu0 %v581_v3  ;;  %513 = vmatpush3.bf16.msra.mxu1 %v581_v3 }
  0x64   : > { %485 = vmatprep.subr.bf16.mxu0 %v582_v4  ;;  %506 = vmatprep.subr.bf16.mxu1 %v582_v4 }
  0x67   : > { %486 = vmatpush3.bf16.msra.mxu0 %v582_v4  ;;  %514 = vmatpush3.bf16.msra.mxu1 %v582_v4 }
  0x68   : > { %487 = vmatprep.subr.bf16.mxu0 %v583_v7  ;;  %507 = vmatprep.subr.bf16.mxu1 %v583_v7 }
  0x6b   : > { %488 = vmatpush3.bf16.msra.mxu0 %v583_v7  ;;  %515 = vmatpush3.bf16.msra.mxu1 %v583_v7 }
  0x6c   : > { %489 = vmatprep.subr.bf16.mxu0 %v584_v8  ;;  %508 = vmatprep.subr.bf16.mxu1 %v584_v8 }
  0x6f   : > { %490 = vmatpush3.bf16.msra.mxu0 %v584_v8  ;;  %516 = vmatpush3.bf16.msra.mxu1 %v584_v8 }
  0x70   : > { %491 = vmatprep.subr.bf16.mxu0 %v585_v9  ;;  %509 = vmatprep.subr.bf16.mxu1 %v585_v9 }
  0x73   : > { %492 = vmatpush3.bf16.msra.mxu0 %v585_v9  ;;  %517 = vmatpush3.bf16.msra.mxu1 %v585_v9 }
  0x74   : > { %493 = vmatprep.subr.bf16.mxu0 %v586_v10  ;;  %510 = vmatprep.subr.bf16.mxu1 %v586_v10 }
  0x77   : > { %494 = vmatpush3.bf16.msra.mxu0 %v586_v10  ;;  %518 = vmatpush3.bf16.msra.mxu1 %v586_v10 }
  0x7a   : > { %496 = vmatmul.mubr.bf16.vlgmr.msra.gmra.mrb[0].mxu0 %v588_v11  ;;  %500 = vmatmul.mubr.bf16.vlgmr.msra.gmra.mrb[0].mxu1 %v590_v12 }
 0x14d   : > { %v497_v13 = vpop.f32.mrb[0].mxu0  ;;  %v501_v14 = vpop.f32.mrb[0].mxu1 }
 0x14e   : > { %v302_v15 = vpop.f32.mrb[1].mxu0  ;;  %v318_v16 = vpop.f32.mrb[1].mxu1  ;;  %v348_v24 = vmul.f32 %v497_v13, %v497_v13  ;;  %v352_v36 = vmul.f32 %v501_v14, %v501_v14 }
 0x14f   : > { %v498_v17 = vpop.f32.mrb[2].mxu0  ;;  %v502_v18 = vpop.f32.mrb[2].mxu1  ;;  %v346_v21 = vmul.f32 %v302_v15, %v302_v15  ;;  %v350_v30 = vmul.f32 %v318_v16, %v318_v16 }
 0x150   : > { %v305_v19 = vpop.f32.mrb[3].mxu0  ;;  %v321_v20 = vpop.f32.mrb[3].mxu1  ;;  %v349_v27 = vmul.f32 %v498_v17, %v498_v17  ;;  %v353_v39 = vmul.f32 %v502_v18, %v502_v18 }
 0x151   : > { %v333_v22 = vadd.f32 %v305_v19, %v302_v15  ;;  %v347_v23 = vmul.f32 %v305_v19, %v305_v19  ;;  %v351_v35 = vmul.f32 %v321_v20, %v321_v20 }
 0x153   : > { %v334_v25 = vadd.f32 %v497_v13, %v333_v22  ;;  %v354_v26 = vadd.f32 %v347_v23, %v346_v21 }
 0x155   : > { %v355_v28 = vadd.f32 %v354_v26, %v348_v24  ;;  %v335_v29 = vadd.f32 %v498_v17, %v334_v25 }
 0x157   : > { %v336_v31 = vadd.f32 %v335_v29, %v318_v16  ;;  %v356_v32 = vadd.f32 %v355_v28, %v349_v27 }
 0x159   : > { %v357_v33 = vadd.f32 %v356_v32, %v350_v30  ;;  %v337_v34 = vadd.f32 %v336_v31, %v321_v20 }
 0x15b   : > { %v338_v37 = vadd.f32 %v501_v14, %v337_v34  ;;  %v358_v38 = vadd.f32 %v357_v33, %v351_v35 }
 0x15d   : > { %v339_v40 = vadd.f32 %v502_v18, %v338_v37  ;;  %v359_v41 = vadd.f32 %v358_v38, %v352_v36 }
 0x15f   : > { %v340_v42 = vrot.slane %v339_v40, 4  ;;  %v360_v43 = vadd.f32 %v359_v41, %v353_v39 }
 0x161   : > { %v341_v44 = vadd.f32 %v340_v42, %v339_v40  ;;  %v361_v45 = vrot.slane %v360_v43, 4 }
 0x163   : > { %v342_v46 = vrot.slane %v341_v44, 2  ;;  %v362_v47 = vadd.f32 %v361_v45, %v360_v43 }
 0x165   : > { %v343_v48 = vadd.f32 %v342_v46, %v341_v44  ;;  %v363_v49 = vrot.slane %v362_v47, 2 }
 0x167   : > { %v344_v50 = vrot.slane %v343_v48, 1  ;;  %v364_v51 = vadd.f32 %v363_v49, %v362_v47 }
 0x169   : > { %v365_v52 = vrot.slane %v364_v51, 1  ;;  %v345_v53 = vadd.f32 %v344_v50, %v343_v48 }
 0x16b   : > { %v366_v54 = vadd.f32 %v365_v52, %v364_v51 }
 0x16d   : > { %v369_v56 = vsel %vm368_vm0, %v345_v53, %v366_v54 }
 0x16e   : > { %v370_v57 = vadd.f32 %v369_v56, %v367_v55 }
 0x170   : > { %371 = vst [vmem:[#allocation7] sm:$0x3] %v370_v57 }
 0x171   : > { %662 = shalt.err (!%p659_p0)
}
 0x172   : > { %s663_s17 = scalar_lea.hbm %s917_s2, 32 }
 0x173   : > { %p664_p2 = scmp.ne.s32.totalorder %s917_s2, %s663_s17  ;;  %p669_p3 = scmp.lt.u32.totalorder %s663_s17, %s917_s2 }
 0x175   : > { %p665_p11 = pnand %p664_p2, %p540_p1 }
 0x177   : > { %p666_p13 = pneg %p665_p11 }
 0x179   : > { %p671_p8 = pnand %p669_p3, %p666_p13 }
 0x17b   : > { %674 = shalt.err (!%p671_p8)
}
 0x17c   : > { %526 = dma.vmem_to_hbm [thread:$0]  (%p540_p1), %s380_s15, 32, %s917_s2, [#allocation4]  }
 0x17d   : > { %700 = dma.done.wait (%p540_p1), [#allocation4], 32  }
 0x17e   : > { %702 = vsyncadd (%p540_p1), [#allocation4], 4294967264 }
 0x17f PF: > { %p14_p7 = scmp.ge.s32.totalorder %s785_s19, 4   ;;  %s930_s9 = smov %s709_s10 }
 0x180   : > { %s931_s10 = smov %s713_s11  ;;  %s932_s11 = smov %s814_s6 }
 0x181   : > { %s933_s12 = smov %s785_s19  ;;  %16 = sbr.rel (!%p14_p7) target bundleno = 5 (0x5), region = 73 }
 0x188   :  { %392 = vsyncpa [#allocation3], 1 }
 0x189   :  { %394 = vsyncpa [#allocation3 + $0x1], 1 }
 0x18a   :  { %395 = vsyncpa [#allocation6], 1 }
 0x18b   :  { %396 = vsyncpa [#allocation4], 1 }
 0x18c   :  { %398 = vsyncpa [#allocation4 + $0x1], 1 }

</bundles_post_ra>
